<compile_context>
chip_gen: v6e
topology: v6e:2x2x1
jax: 0.10.0
libtpu: 0.0.40
codegen_flags: <defaults>
</compile_context>

<pallas_src>
import numpy as np
import jax
import jax.numpy as jnp
from jax.experimental import pallas as pl
from jax.experimental.pallas import tpu as pltpu


# --------------------------------- kernel -----------------------------------
def mf_kernel(d_ref, mha_ref, mhe_ref, oa_ref, oe_ref):
    # d_ref  : (2, bt, K)   stage-1 result, channels {A, E} leading, stream dtype
    # mh*_ref: (K, ct)      per-channel circulant column tile (1/hh_sqrt folded in)
    # o*_ref : (bt, ct)     lane-dense (multiple-of-128) f32 output tiles
    oa_ref[...] = jnp.dot(d_ref[0], mha_ref[...],
                          preferred_element_type=jnp.float32).astype(oa_ref.dtype)
    oe_ref[...] = jnp.dot(d_ref[1], mhe_ref[...],
                          preferred_element_type=jnp.float32).astype(oe_ref.dtype)


# -------------------- one-time weight preparation (glue) --------------------
def prepare_mf_weights(template, hh_sqrt, S_t_m12, weight_dtype=jnp.bfloat16,
                       col_tile_cap=4096):
    """Build the circulant matmul weights once (layer weights are fixed buffers).

    Returns:
      M_S  : (K, K) float32   first-stage circulant (stage 1 is tiny, kept f32)
      M_HA : (K, NtKp) wdt    second-stage circulant, channel A, 1/hh_sqrt folded in
      M_HE : (K, NtKp) wdt    second-stage circulant, channel E, 1/hh_sqrt folded in
    NtKp = Nt*K zero-padded up to a multiple of a lane-dense column tile so the
    forward pass always gets unmasked, >=128-wide stores and >=0.5 MiB weight DMAs
    even for prime Nt or K % 128 != 0.
    """
    template = jnp.asarray(template, jnp.float32)
    hh_sqrt = jnp.asarray(hh_sqrt, jnp.float32)
    S_t_m12 = jnp.asarray(S_t_m12, jnp.float32)
    K = S_t_m12.shape[-1]
    Nt, _, T = template.shape
    r = jnp.arange(K)

    # Stage 1:  d[r] = sum_j xfold[j] * s[(j - r - 1) % K]
    s = S_t_m12.reshape(K)
    M_S = s[(r[:, None] - r[None, :] - 1) % K]                     # (K, K)  [j, r]

    # Stage 2:  out[r] = sum_k h[k] * d[(r + k - (T-1)) % K]
    #   fold template mod K, then gather: M_H[t,c,j,r] = hfold[t,c,(j - r + T - 1) % K]
    Tp = -(-T // K) * K
    hf = jnp.pad(template, ((0, 0), (0, 0), (0, Tp - T)))
    hf = hf.reshape(Nt, 2, Tp // K, K).sum(2)                      # (Nt, 2, K)
    idx = (r[:, None] - r[None, :] + (T - 1)) % K                  # (j, r)
    M_H = hf[:, :, idx]                                            # (Nt, 2, K, K)
    M_H = M_H * (1.0 / hh_sqrt)[:, :, None, None]                  # fold normalization in
    M_H = jnp.transpose(M_H, (1, 2, 0, 3)).reshape(2, K, Nt * K)   # columns = t*K + r

    # Pad the column axis to a multiple of the largest reasonable column tile
    # (multiple of 128, <=25% padded-column waste, double-buffered tiles <=16 MiB).
    NtK = Nt * K
    itm = jnp.dtype(weight_dtype).itemsize
    ct = 128
    for m in range(min(col_tile_cap, max(NtK, 128)) // 128, 0, -1):
        cand = m * 128
        pad = (-NtK) % cand
        if pad * 4 <= max(NtK, 1) and 2 * 2 * K * cand * itm <= 16 * 1024 * 1024:
            ct = cand
            break
    NtKp = -(-NtK // ct) * ct
    M_H = jnp.pad(M_H, ((0, 0), (0, 0), (0, NtKp - NtK)))

    wd = weight_dtype
    return M_S.astype(jnp.float32), M_H[0].astype(wd), M_H[1].astype(wd)


# ------------------------------ forward pass --------------------------------
def mf_forward(X, M_S, M_HA, M_HE, *, Nt):
    """X: (B, 2, L) float32 -> (B, Nt, 2, K) float32."""
    B, C, L = X.shape
    assert C == 2
    K = M_S.shape[0]
    NtKp = M_HA.shape[1]
    wdt = M_HA.dtype
    itm_w = jnp.dtype(wdt).itemsize

    # --- glue: mod-K fold of the signal (kernel VMEM independent of L) and the
    #     shared first conv stage.  Stage 1 is 2*B*K*K flops (<1% of stage 2);
    #     precomputing it here removes all carried state from the Pallas grid so
    #     every weight tile is DMA'd exactly once and both axes stay "parallel".
    Lp = pl.cdiv(L, K) * K
    Xp = jnp.pad(X, ((0, 0), (0, 0), (0, Lp - L)))
    xf = Xp.reshape(B, 2, Lp // K, K).sum(2)                    # (B, 2, K) f32
    xf = jnp.transpose(xf, (1, 0, 2))                           # (2, B, K)
    d = jnp.einsum('cbk,kj->cbj', xf, M_S,
                   precision=jax.lax.Precision.HIGHEST)         # (2, B, K) f32

    # --- batch tiling: 256 rows fills the 256-wide MXU on v6e/v7x ---
    B8 = -(-B // 8) * 8
    bt = min(B8, 256)
    Bp = -(-B8 // bt) * bt
    nb = Bp // bt
    d = jnp.pad(d, ((0, 0), (0, Bp - B), (0, 0))).astype(wdt)   # cast ONCE to stream dtype

    # --- generation-aware VMEM budget ---
    try:
        cap = int(getattr(pltpu.get_tpu_info(), "vmem_capacity_bytes", 0))
    except Exception:
        cap = 0
    if cap <= 0:
        cap = 64 * 1024 * 1024                                  # v7x-safe default
    budget = max(min(cap * 3 // 4, cap - 8 * 1024 * 1024), 32 * 1024 * 1024)

    # --- column tile: largest lane-dense divisor of NtKp that fits the budget ---
    def step_bytes(c):
        return (2 * 2 * bt * K * itm_w        # d tile (double-buffered)
                + 2 * 2 * K * c * itm_w       # M_HA + M_HE tiles (double-buffered)
                + 2 * 2 * bt * c * 4)         # two f32 output tiles

    ct = 128
    for m in range(min(4096, NtKp) // 128, 0, -1):
        cand = m * 128
        if NtKp % cand == 0 and step_bytes(cand) <= budget:
            ct = cand
            break
    nc = NtKp // ct

    flops = 2 * 2 * Bp * K * NtKp
    bytes_accessed = (nc * 2 * Bp * K * itm_w     # d re-read once per column tile
                      + 2 * K * NtKp * itm_w      # weights: streamed exactly once
                      + 2 * Bp * NtKp * 4)        # outputs: written once

    out_a, out_e = pl.pallas_call(
        mf_kernel,
        out_shape=(jax.ShapeDtypeStruct((Bp, NtKp), jnp.float32),
                   jax.ShapeDtypeStruct((Bp, NtKp), jnp.float32)),
        grid_spec=pltpu.PrefetchScalarGridSpec(
            num_scalar_prefetch=0,
            # Columns OUTER, batch INNER: the weight block index only changes on
            # the outer axis, so each (K, ct) weight tile is DMA'd once total.
            grid=(nc, nb),
            in_specs=[
                pl.BlockSpec((2, bt, K), lambda c, b: (0, b, 0)),   # stage-1 result
                pl.BlockSpec((K, ct), lambda c, b: (0, c)),         # M_HA (hh-scaled)
                pl.BlockSpec((K, ct), lambda c, b: (0, c)),         # M_HE (hh-scaled)
            ],
            out_specs=[
                pl.BlockSpec((bt, ct), lambda c, b: (b, c)),
                pl.BlockSpec((bt, ct), lambda c, b: (b, c)),
            ],
        ),
        compiler_params=pltpu.CompilerParams(
            # No carried scratch -> both axes are safe as "parallel": v7x megacore
            # can shard either the column or the batch axis.
            dimension_semantics=("parallel", "parallel"),
            vmem_limit_bytes=int(budget)),
        cost_estimate=pl.CostEstimate(flops=int(flops), transcendentals=0,
                                      bytes_accessed=int(bytes_accessed)),
    )(d, M_HA, M_HE)

    # --- glue: back to the torch output layout (B, Nt, 2, K) ---
    NtK = Nt * K
    out = jnp.stack([out_a[:B, :NtK].reshape(B, Nt, K),
                     out_e[:B, :NtK].reshape(B, Nt, K)], axis=-2)
    return out


# -------- pure-numpy reference of the literal PyTorch forward (float64) --------
def ref_forward_np(X, template, hh_sqrt, S_t_m12):
    X = np.asarray(X, np.float64)
    template = np.asarray(template, np.float64)
    hh = np.asarray(hh_sqrt, np.float64)
    S = np.asarray(S_t_m12, np.float64)
    B = X.shape[0]
    K = S.shape[-1]
    Nt, _, T = template.shape

    def conv_fold(x, w, pad, m):
        a = np.pad(x, (pad, pad))
        y = np.correlate(a, w, mode='valid')        # == F.conv1d (cross-correlation)
        y = np.pad(y, (0, (-y.shape[0]) % m)).reshape(-1, m).sum(0)   # == _mod
        return y

    s = S[0, 0]
    out = np.zeros((B, Nt, 2, K))
    for b in range(B):
        d_a = conv_fold(X[b, 0], s, K - 1, K)
        d_e = conv_fold(X[b, 1], s, K - 1, K)
        for t in range(Nt):
            out[b, t, 0] = conv_fold(d_a, template[t, 0], T - 1, K)
            out[b, t, 1] = conv_fold(d_e, template[t, 1], T - 1, K)
    return out / hh[None, :, :, None]


if __name__ == "__main__":
    B, L = 2, 256          # batch, signal length
    K = 128                # data_size = S_t_m12.shape[-1]
    T = 32                 # temp_size = template.shape[-1]
    Nt = 4                 # number of templates

    key = jax.random.PRNGKey(0)
    kx, kt, kh, ks = jax.random.split(key, 4)
    X = jax.random.normal(kx, (B, 2, L), dtype=jnp.float32)
    template = jax.random.normal(kt, (Nt, 2, T), dtype=jnp.float32)
    hh_sqrt = jax.random.uniform(kh, (Nt, 2), dtype=jnp.float32,
                                 minval=0.5, maxval=1.5)
    S_t_m12 = jax.random.normal(ks, (1, 1, K), dtype=jnp.float32)

    ref = ref_forward_np(X, template, hh_sqrt, S_t_m12)
    fwd = jax.jit(mf_forward, static_argnames=("Nt",))

    # f32 weight streams: tight check against the literal PyTorch math.
    W32 = prepare_mf_weights(template, hh_sqrt, S_t_m12, jnp.float32)
    out = jax.block_until_ready(fwd(X, *W32, Nt=Nt))
    assert out.shape == (B, Nt, 2, K), out.shape
    err32 = np.max(np.abs(np.asarray(out, np.float64) - ref)) / np.max(np.abs(ref))
    assert err32 < 1e-4, f"f32 relative error too large: {err32}"

    # bf16 weight/activation streams (default; f32 accumulation): halves the
    # dominant weight + activation HBM traffic and VMEM footprint.
    W16 = prepare_mf_weights(template, hh_sqrt, S_t_m12, jnp.bfloat16)
    out16 = jax.block_until_ready(fwd(X, *W16, Nt=Nt))
    err16 = np.max(np.abs(np.asarray(out16, np.float64) - ref)) / np.max(np.abs(ref))
    assert err16 < 2e-2, f"bf16 relative error too large: {err16}"

    print("KERNEL_OK")
</pallas_src>

<mosaic_0001>
module attributes {stable_mosaic.version = 11 : i64} {
  func.func @mf_kernel(%arg0: i32, %arg1: i32, %arg2: memref<2x8x128xf32, #tpu.memory_space<vmem>>, %arg3: memref<128x512xf32, #tpu.memory_space<vmem>>, %arg4: memref<128x512xf32, #tpu.memory_space<vmem>>, %arg5: memref<8x512xf32, #tpu.memory_space<vmem>>, %arg6: memref<8x512xf32, #tpu.memory_space<vmem>>) attributes {dimension_semantics = [#tpu.dimension_semantics<parallel>, #tpu.dimension_semantics<parallel>], iteration_bounds = array<i64: 1, 1>, scalar_prefetch = 0 : i64, scratch_operands = 0 : i64, tpu.core_type = #tpu.core_type<tc>, window_params = [{transform_indices = @transform_0, window_bounds = array<i64: 2, 8, 128>}, {transform_indices = @transform_1, window_bounds = array<i64: 128, 512>}, {transform_indices = @transform_2, window_bounds = array<i64: 128, 512>}, {transform_indices = @transform_3, window_bounds = array<i64: 8, 512>}, {transform_indices = @transform_4, window_bounds = array<i64: 8, 512>}]} {
    %c0 = arith.constant 0 : index
    %c0_0 = arith.constant 0 : index
    %c0_1 = arith.constant 0 : index
    %0 = vector.load %arg2[%c0, %c0_0, %c0_1] : memref<2x8x128xf32, #tpu.memory_space<vmem>>, vector<1x8x128xf32>
    %1 = vector.shape_cast %0 : vector<1x8x128xf32> to vector<8x128xf32>
    %c0_2 = arith.constant 0 : index
    %c0_3 = arith.constant 0 : index
    %2 = vector.load %arg3[%c0_2, %c0_3] : memref<128x512xf32, #tpu.memory_space<vmem>>, vector<128x512xf32>
    %cst = arith.constant dense<0.000000e+00> : vector<8x512xf32>
    %3 = tpu.matmul %1, %2, %cst {dimension_numbers = #tpu.dot_dimension_numbers<[1], [0], [0], [1], [0, 0, 1, 1], [], []>} : vector<8x128xf32>, vector<128x512xf32>, vector<8x512xf32> -> vector<8x512xf32>
    %c0_4 = arith.constant 0 : index
    %c0_5 = arith.constant 0 : index
    %4 = vector.load %arg5[%c0_4, %c0_5] : memref<8x512xf32, #tpu.memory_space<vmem>>, vector<8x512xf32>
    tpu.vector_store %arg5[%c0_4, %c0_5], %3 {strides = array<i32>} : memref<8x512xf32, #tpu.memory_space<vmem>>, vector<8x512xf32>,
    %c1 = arith.constant 1 : index
    %c0_6 = arith.constant 0 : index
    %c0_7 = arith.constant 0 : index
    %5 = vector.load %arg2[%c1, %c0_6, %c0_7] : memref<2x8x128xf32, #tpu.memory_space<vmem>>, vector<1x8x128xf32>
    %6 = vector.shape_cast %5 : vector<1x8x128xf32> to vector<8x128xf32>
    %c0_8 = arith.constant 0 : index
    %c0_9 = arith.constant 0 : index
    %7 = vector.load %arg4[%c0_8, %c0_9] : memref<128x512xf32, #tpu.memory_space<vmem>>, vector<128x512xf32>
    %cst_10 = arith.constant dense<0.000000e+00> : vector<8x512xf32>
    %8 = tpu.matmul %6, %7, %cst_10 {dimension_numbers = #tpu.dot_dimension_numbers<[1], [0], [0], [1], [0, 0, 1, 1], [], []>} : vector<8x128xf32>, vector<128x512xf32>, vector<8x512xf32> -> vector<8x512xf32>
    %c0_11 = arith.constant 0 : index
    %c0_12 = arith.constant 0 : index
    %9 = vector.load %arg6[%c0_11, %c0_12] : memref<8x512xf32, #tpu.memory_space<vmem>>, vector<8x512xf32>
    tpu.vector_store %arg6[%c0_11, %c0_12], %8 {strides = array<i32>} : memref<8x512xf32, #tpu.memory_space<vmem>>, vector<8x512xf32>,
    return
  }
  func.func @transform_0(%arg0: i32, %arg1: i32) -> (i32, i32, i32) {
    %c0_i32 = arith.constant 0 : i32
    %c0_i32_0 = arith.constant 0 : i32
    %c0_i32_1 = arith.constant 0 : i32
    return %c0_i32, %arg1, %c0_i32_0 : i32, i32, i32
  }
  func.func @transform_1(%arg0: i32, %arg1: i32) -> (i32, i32) {
    %c0_i32 = arith.constant 0 : i32
    %c0_i32_0 = arith.constant 0 : i32
    return %c0_i32, %arg0 : i32, i32
  }
  func.func @transform_2(%arg0: i32, %arg1: i32) -> (i32, i32) {
    %c0_i32 = arith.constant 0 : i32
    %c0_i32_0 = arith.constant 0 : i32
    return %c0_i32, %arg0 : i32, i32
  }
  func.func @transform_3(%arg0: i32, %arg1: i32) -> (i32, i32) {
    %c0_i32 = arith.constant 0 : i32
    return %arg1, %arg0 : i32, i32
  }
  func.func @transform_4(%arg0: i32, %arg1: i32) -> (i32, i32) {
    %c0_i32 = arith.constant 0 : i32
    return %arg1, %arg0 : i32, i32
  }
}

</mosaic_0001>

<bundles_post_ra>
// kernel: mf_forward.1
= control target key start
LH: loop header
LB: loop body
LE: loop exit
PB: predicated region body
PF: predicated region fallthrough
CT: control target
= control target key end

     0   :  { %10 = vsyncpa [#allocation3], 0  ;;  %s597_s0 = inlined_call_operand.vmem [shape: f32[2,8,128], index: 0, kind: input, shape index: {}]   ;;  %s598_s1 = inlined_call_operand.hbm [shape: f32[128,512], index: 1, kind: input, shape index: {}]   ;;  %s599_s2 = inlined_call_operand.hbm [shape: f32[128,512], index: 2, kind: input, shape index: {}]   ;;  %s600_s3 = inlined_call_operand.vmem [shape: f32[8,512], index: 3, kind: output, shape index: {0}]   ;;  %s601_s4 = inlined_call_operand.vmem [shape: f32[8,512], index: 4, kind: output, shape index: {1}]  }
   0x1   :  { %11 = vsyncpa [#allocation5], 0  ;;  %s527_s15 = smov [#allocation2]  }
   0x2   :  { %s19_s16 = sshll.u32 %s527_s15, 4  ;;  %s20_s16 = int_to_ptr.vmem [resolvable:$true] %s19_s16 }
   0x3   :  { %s491_s17 = scalar_lea.vmem %s20_s16, 8192  ;;  %p496_p1 = scmp.lt.s32.totalorder %s20_s16, %s20_s16 }
   0x4   :  { %p492_p0 = scmp.ne.s32.totalorder %s20_s16, %s491_s17  ;;  %p497_p2 = scmp.lt.s32.totalorder %s491_s17, %s491_s17 }
   0x6   :  { %p498_p3 = por %p497_p2, %p496_p1 }
   0x8   :  { %p499_p4 = pnand %p498_p3, %p492_p0 }
   0xa   :  { %502 = shalt.err (!%p499_p4)
}
   0xb   :  { %s528_s18 = smov 512   ;;  %s529_s19 = smov 32  }
   0xc   :  { %25 = dma.hbm_to_vmem [thread:$0]  %s598_s1, 8192, %s20_s16, [#allocation3], %s528_s18, %s528_s18, %s529_s19  }
   0xd   :  { %s530_s22 = smov [#allocation4]  }
   0xe   :  { %s31_s23 = sshll.u32 %s530_s22, 4  ;;  %s32_s23 = int_to_ptr.vmem [resolvable:$true] %s31_s23 }
   0xf   :  { %s511_s24 = scalar_lea.vmem %s32_s23, 8192  ;;  %p516_p6 = scmp.lt.s32.totalorder %s32_s23, %s32_s23 }
  0x10   :  { %p512_p5 = scmp.ne.s32.totalorder %s32_s23, %s511_s24  ;;  %p517_p7 = scmp.lt.s32.totalorder %s511_s24, %s511_s24 }
  0x12   :  { %p518_p8 = por %p517_p7, %p516_p6 }
  0x14   :  { %p519_p9 = pnand %p518_p8, %p512_p5 }
  0x16   :  { %522 = shalt.err (!%p519_p9)
}
  0x17   :  { %37 = dma.hbm_to_vmem [thread:$0]  %s599_s2, 8192, %s32_s23, [#allocation5], %s528_s18, %s528_s18, %s529_s19  }
  0x18   :  { %523 = dma.done.wait [#allocation3], 8192  }
  0x19   :  { %524 = vsyncadd [#allocation3], 4294959104 }
  0x1a   :  { %525 = dma.done.wait [#allocation5], 8192  }
  0x1b   :  { %526 = vsyncadd [#allocation5], 4294959104  ;;  %v531_v0 = vmov 0.0   ;;  %v106_v1 = vld [vmem:[#allocation2 + $0x1e8] sm:$0xff]  ;;  %v108_v2 = vld [vmem:[#allocation2 + $0x1f8] sm:$0xff] }
  0x1c   :  { %173 = vmatprep.mubr.f32.mxu0 %v531_v0  ;;  %244 = vmatprep.mubr.f32.mxu1 %v531_v0  ;;  %v105_v3 = vld [vmem:[#allocation2 + $0x1e0] sm:$0xff]  ;;  %v107_v4 = vld [vmem:[#allocation2 + $0x1f0] sm:$0xff]  ;;  %v102_v5 = vld [vmem:[#allocation2 + $0x1c8] sm:$0xff] }
  0x1d   :  { %109 = vmatprep.subr.mxu0 %v106_v1  ;;  %180 = vmatprep.subr.mxu1 %v108_v2  ;;  %v104_v6 = vld [vmem:[#allocation2 + $0x1d8] sm:$0xff]  ;;  %v101_v7 = vld [vmem:[#allocation2 + $0x1c0] sm:$0xff]  ;;  %v103_v8 = vld [vmem:[#allocation2 + $0x1d0] sm:$0xff] }
  0x1e   :  { %110 = vmatpush1.msra.mxu0 %v105_v3  ;;  %181 = vmatpush1.msra.mxu1 %v107_v4  ;;  %v98_v9 = vld [vmem:[#allocation2 + $0x1a8] sm:$0xff]  ;;  %v100_v10 = vld [vmem:[#allocation2 + $0x1b8] sm:$0xff]  ;;  %v97_v11 = vld [vmem:[#allocation2 + $0x1a0] sm:$0xff] }
  0x1f   :  { %111 = vmatprep.subr.mxu0 %v102_v5  ;;  %182 = vmatprep.subr.mxu1 %v104_v6  ;;  %v99_v12 = vld [vmem:[#allocation2 + $0x1b0] sm:$0xff]  ;;  %v94_v13 = vld [vmem:[#allocation2 + $0x188] sm:$0xff]  ;;  %v96_v14 = vld [vmem:[#allocation2 + $0x198] sm:$0xff] }
  0x20   :  { %112 = vmatpush1.msra.mxu0 %v101_v7  ;;  %183 = vmatpush1.msra.mxu1 %v103_v8  ;;  %v93_v15 = vld [vmem:[#allocation2 + $0x180] sm:$0xff]  ;;  %v95_v16 = vld [vmem:[#allocation2 + $0x190] sm:$0xff]  ;;  %v90_v17 = vld [vmem:[#allocation2 + $0x168] sm:$0xff] }
  0x21   :  { %113 = vmatprep.subr.mxu0 %v98_v9  ;;  %184 = vmatprep.subr.mxu1 %v100_v10  ;;  %v92_v18 = vld [vmem:[#allocation2 + $0x178] sm:$0xff]  ;;  %v89_v19 = vld [vmem:[#allocation2 + $0x160] sm:$0xff]  ;;  %v91_v20 = vld [vmem:[#allocation2 + $0x170] sm:$0xff] }
  0x22   :  { %114 = vmatpush1.msra.mxu0 %v97_v11  ;;  %185 = vmatpush1.msra.mxu1 %v99_v12  ;;  %v86_v21 = vld [vmem:[#allocation2 + $0x148] sm:$0xff]  ;;  %v88_v22 = vld [vmem:[#allocation2 + $0x158] sm:$0xff]  ;;  %v85_v23 = vld [vmem:[#allocation2 + $0x140] sm:$0xff] }
  0x23   :  { %115 = vmatprep.subr.mxu0 %v94_v13  ;;  %186 = vmatprep.subr.mxu1 %v96_v14  ;;  %v87_v24 = vld [vmem:[#allocation2 + $0x150] sm:$0xff]  ;;  %v82_v25 = vld [vmem:[#allocation2 + $0x128] sm:$0xff]  ;;  %v84_v26 = vld [vmem:[#allocation2 + $0x138] sm:$0xff] }
  0x24   :  { %116 = vmatpush1.msra.mxu0 %v93_v15  ;;  %187 = vmatpush1.msra.mxu1 %v95_v16  ;;  %v81_v27 = vld [vmem:[#allocation2 + $0x120] sm:$0xff]  ;;  %v83_v28 = vld [vmem:[#allocation2 + $0x130] sm:$0xff]  ;;  %v78_v29 = vld [vmem:[#allocation2 + $0x108] sm:$0xff] }
  0x25   :  { %117 = vmatprep.subr.mxu0 %v90_v17  ;;  %188 = vmatprep.subr.mxu1 %v92_v18  ;;  %v80_v30 = vld [vmem:[#allocation2 + $0x118] sm:$0xff]  ;;  %v77_v31 = vld [vmem:[#allocation2 + $0x100] sm:$0xff]  ;;  %v79_v32 = vld [vmem:[#allocation2 + $0x110] sm:$0xff] }
  0x26   :  { %118 = vmatpush1.msra.mxu0 %v89_v19  ;;  %189 = vmatpush1.msra.mxu1 %v91_v20  ;;  %v74_v33 = vld [vmem:[#allocation2 + $0xe8] sm:$0xff]  ;;  %v76_v34 = vld [vmem:[#allocation2 + $0xf8] sm:$0xff]  ;;  %v73_v35 = vld [vmem:[#allocation2 + $0xe0] sm:$0xff] }
  0x27   :  { %119 = vmatprep.subr.mxu0 %v86_v21  ;;  %190 = vmatprep.subr.mxu1 %v88_v22  ;;  %v75_v36 = vld [vmem:[#allocation2 + $0xf0] sm:$0xff]  ;;  %v70_v37 = vld [vmem:[#allocation2 + $0xc8] sm:$0xff]  ;;  %v72_v38 = vld [vmem:[#allocation2 + $0xd8] sm:$0xff] }
  0x28   :  { %120 = vmatpush1.msra.mxu0 %v85_v23  ;;  %191 = vmatpush1.msra.mxu1 %v87_v24  ;;  %v69_v39 = vld [vmem:[#allocation2 + $0xc0] sm:$0xff]  ;;  %v71_v40 = vld [vmem:[#allocation2 + $0xd0] sm:$0xff]  ;;  %v66_v41 = vld [vmem:[#allocation2 + $0xa8] sm:$0xff] }
  0x29   :  { %121 = vmatprep.subr.mxu0 %v82_v25  ;;  %192 = vmatprep.subr.mxu1 %v84_v26  ;;  %v68_v42 = vld [vmem:[#allocation2 + $0xb8] sm:$0xff]  ;;  %v65_v43 = vld [vmem:[#allocation2 + $0xa0] sm:$0xff]  ;;  %v67_v44 = vld [vmem:[#allocation2 + $0xb0] sm:$0xff] }
  0x2a   :  { %122 = vmatpush1.msra.mxu0 %v81_v27  ;;  %193 = vmatpush1.msra.mxu1 %v83_v28  ;;  %v62_v45 = vld [vmem:[#allocation2 + $0x88] sm:$0xff]  ;;  %v64_v46 = vld [vmem:[#allocation2 + $0x98] sm:$0xff]  ;;  %v61_v47 = vld [vmem:[#allocation2 + $0x80] sm:$0xff] }
  0x2b   :  { %123 = vmatprep.subr.mxu0 %v78_v29  ;;  %194 = vmatprep.subr.mxu1 %v80_v30  ;;  %v63_v48 = vld [vmem:[#allocation2 + $0x90] sm:$0xff]  ;;  %v58_v49 = vld [vmem:[#allocation2 + $0x68] sm:$0xff]  ;;  %v60_v50 = vld [vmem:[#allocation2 + $0x78] sm:$0xff] }
  0x2c   :  { %124 = vmatpush1.msra.mxu0 %v77_v31  ;;  %195 = vmatpush1.msra.mxu1 %v79_v32  ;;  %v57_v51 = vld [vmem:[#allocation2 + $0x60] sm:$0xff]  ;;  %v59_v52 = vld [vmem:[#allocation2 + $0x70] sm:$0xff]  ;;  %v54_v53 = vld [vmem:[#allocation2 + $0x48] sm:$0xff] }
  0x2d   :  { %125 = vmatprep.subr.mxu0 %v74_v33  ;;  %196 = vmatprep.subr.mxu1 %v76_v34  ;;  %v56_v54 = vld [vmem:[#allocation2 + $0x58] sm:$0xff]  ;;  %v53_v55 = vld [vmem:[#allocation2 + $0x40] sm:$0xff]  ;;  %v55_v56 = vld [vmem:[#allocation2 + $0x50] sm:$0xff] }
  0x2e   :  { %126 = vmatpush1.msra.mxu0 %v73_v35  ;;  %197 = vmatpush1.msra.mxu1 %v75_v36  ;;  %v50_v57 = vld [vmem:[#allocation2 + $0x28] sm:$0xff]  ;;  %v52_v58 = vld [vmem:[#allocation2 + $0x38] sm:$0xff]  ;;  %v49_v59 = vld [vmem:[#allocation2 + $0x20] sm:$0xff] }
  0x2f   :  { %127 = vmatprep.subr.mxu0 %v70_v37  ;;  %198 = vmatprep.subr.mxu1 %v72_v38  ;;  %v51_v60 = vld [vmem:[#allocation2 + $0x30] sm:$0xff]  ;;  %v46_v61 = vld [vmem:[#allocation2 + $0x8] sm:$0xff]  ;;  %v48_v62 = vld [vmem:[#allocation2 + $0x18] sm:$0xff] }
  0x30   :  { %128 = vmatpush1.msra.mxu0 %v69_v39  ;;  %199 = vmatpush1.msra.mxu1 %v71_v40  ;;  %v45_v63 = vld [vmem:[#allocation2] sm:$0xff]  ;;  %v47_v1 = vld [vmem:[#allocation2 + $0x10] sm:$0xff]  ;;  %v318_v3 = vld [vmem:[#allocation4 + $0x1e8] sm:$0xff] }
  0x31   :  { %129 = vmatprep.subr.mxu0 %v66_v41  ;;  %200 = vmatprep.subr.mxu1 %v68_v42  ;;  %v44_v2 = vld [vmem:[%s597_s0] sm:$0xff]  ;;  %v320_v4 = vld [vmem:[#allocation4 + $0x1f8] sm:$0xff]  ;;  %v319_v6 = vld [vmem:[#allocation4 + $0x1f0] sm:$0xff] }
  0x32   :  { %130 = vmatpush1.msra.mxu0 %v65_v43  ;;  %201 = vmatpush1.msra.mxu1 %v67_v44  ;;  %v317_v5 = vld [vmem:[#allocation4 + $0x1e0] sm:$0xff]  ;;  %v314_v7 = vld [vmem:[#allocation4 + $0x1c8] sm:$0xff]  ;;  %v316_v8 = vld [vmem:[#allocation4 + $0x1d8] sm:$0xff] }
  0x33   :  { %131 = vmatprep.subr.mxu0 %v62_v45  ;;  %202 = vmatprep.subr.mxu1 %v64_v46  ;;  %v313_v9 = vld [vmem:[#allocation4 + $0x1c0] sm:$0xff]  ;;  %v315_v10 = vld [vmem:[#allocation4 + $0x1d0] sm:$0xff]  ;;  %v310_v11 = vld [vmem:[#allocation4 + $0x1a8] sm:$0xff] }
  0x34   :  { %132 = vmatpush1.msra.mxu0 %v61_v47  ;;  %203 = vmatpush1.msra.mxu1 %v63_v48  ;;  %v312_v12 = vld [vmem:[#allocation4 + $0x1b8] sm:$0xff]  ;;  %v309_v13 = vld [vmem:[#allocation4 + $0x1a0] sm:$0xff]  ;;  %v311_v14 = vld [vmem:[#allocation4 + $0x1b0] sm:$0xff] }
  0x35   :  { %133 = vmatprep.subr.mxu0 %v58_v49  ;;  %204 = vmatprep.subr.mxu1 %v60_v50  ;;  %v306_v15 = vld [vmem:[#allocation4 + $0x188] sm:$0xff]  ;;  %v308_v16 = vld [vmem:[#allocation4 + $0x198] sm:$0xff]  ;;  %v305_v17 = vld [vmem:[#allocation4 + $0x180] sm:$0xff] }
  0x36   :  { %134 = vmatpush1.msra.mxu0 %v57_v51  ;;  %205 = vmatpush1.msra.mxu1 %v59_v52  ;;  %v307_v18 = vld [vmem:[#allocation4 + $0x190] sm:$0xff]  ;;  %v302_v19 = vld [vmem:[#allocation4 + $0x168] sm:$0xff]  ;;  %v304_v20 = vld [vmem:[#allocation4 + $0x178] sm:$0xff] }
  0x37   :  { %135 = vmatprep.subr.mxu0 %v54_v53  ;;  %206 = vmatprep.subr.mxu1 %v56_v54  ;;  %v301_v21 = vld [vmem:[#allocation4 + $0x160] sm:$0xff]  ;;  %v303_v22 = vld [vmem:[#allocation4 + $0x170] sm:$0xff]  ;;  %v298_v23 = vld [vmem:[#allocation4 + $0x148] sm:$0xff] }
  0x38   :  { %136 = vmatpush1.msra.mxu0 %v53_v55  ;;  %207 = vmatpush1.msra.mxu1 %v55_v56  ;;  %v300_v24 = vld [vmem:[#allocation4 + $0x158] sm:$0xff]  ;;  %v297_v25 = vld [vmem:[#allocation4 + $0x140] sm:$0xff]  ;;  %v299_v26 = vld [vmem:[#allocation4 + $0x150] sm:$0xff] }
  0x39   :  { %137 = vmatprep.subr.mxu0 %v50_v57  ;;  %208 = vmatprep.subr.mxu1 %v52_v58  ;;  %v294_v27 = vld [vmem:[#allocation4 + $0x128] sm:$0xff]  ;;  %v296_v28 = vld [vmem:[#allocation4 + $0x138] sm:$0xff]  ;;  %v293_v29 = vld [vmem:[#allocation4 + $0x120] sm:$0xff] }
  0x3a   :  { %138 = vmatpush1.msra.mxu0 %v49_v59  ;;  %209 = vmatpush1.msra.mxu1 %v51_v60  ;;  %v295_v30 = vld [vmem:[#allocation4 + $0x130] sm:$0xff]  ;;  %v290_v31 = vld [vmem:[#allocation4 + $0x108] sm:$0xff]  ;;  %v292_v32 = vld [vmem:[#allocation4 + $0x118] sm:$0xff] }
  0x3b   :  { %139 = vmatprep.subr.mxu0 %v46_v61  ;;  %210 = vmatprep.subr.mxu1 %v48_v62  ;;  %v289_v33 = vld [vmem:[#allocation4 + $0x100] sm:$0xff]  ;;  %v291_v34 = vld [vmem:[#allocation4 + $0x110] sm:$0xff]  ;;  %v286_v35 = vld [vmem:[#allocation4 + $0xe8] sm:$0xff] }
  0x3c   :  { %140 = vmatpush1.msra.mxu0 %v45_v63  ;;  %211 = vmatpush1.msra.mxu1 %v47_v1  ;;  %v288_v36 = vld [vmem:[#allocation4 + $0xf8] sm:$0xff]  ;;  %v285_v37 = vld [vmem:[#allocation4 + $0xe0] sm:$0xff]  ;;  %v287_v38 = vld [vmem:[#allocation4 + $0xf0] sm:$0xff] }
  0x3d   :  { %174 = vmatmul.mubr.f32.vlgmr.msra.gmra.mxu0 %v44_v2  ;;  %245 = vmatmul.mubr.f32.vlgmr.msra.gmra.mxu1 %v44_v2  ;;  %v282_v39 = vld [vmem:[#allocation4 + $0xc8] sm:$0xff]  ;;  %v284_v40 = vld [vmem:[#allocation4 + $0xd8] sm:$0xff]  ;;  %v281_v41 = vld [vmem:[#allocation4 + $0xc0] sm:$0xff] }
  0x3e   :  { %321 = vmatprep.subr.mxu0 %v318_v3  ;;  %392 = vmatprep.subr.mxu1 %v320_v4  ;;  %v283_v42 = vld [vmem:[#allocation4 + $0xd0] sm:$0xff]  ;;  %v278_v43 = vld [vmem:[#allocation4 + $0xa8] sm:$0xff]  ;;  %v280_v44 = vld [vmem:[#allocation4 + $0xb8] sm:$0xff] }
  0x3f   :  { %322 = vmatpush1.msra.mxu0 %v317_v5  ;;  %393 = vmatpush1.msra.mxu1 %v319_v6  ;;  %v277_v45 = vld [vmem:[#allocation4 + $0xa0] sm:$0xff]  ;;  %v279_v46 = vld [vmem:[#allocation4 + $0xb0] sm:$0xff]  ;;  %v274_v47 = vld [vmem:[#allocation4 + $0x88] sm:$0xff] }
  0x40   :  { %323 = vmatprep.subr.mxu0 %v314_v7  ;;  %394 = vmatprep.subr.mxu1 %v316_v8  ;;  %v276_v48 = vld [vmem:[#allocation4 + $0x98] sm:$0xff]  ;;  %v273_v49 = vld [vmem:[#allocation4 + $0x80] sm:$0xff]  ;;  %v275_v50 = vld [vmem:[#allocation4 + $0x90] sm:$0xff] }
  0x41   :  { %324 = vmatpush1.msra.mxu0 %v313_v9  ;;  %395 = vmatpush1.msra.mxu1 %v315_v10  ;;  %v270_v51 = vld [vmem:[#allocation4 + $0x68] sm:$0xff]  ;;  %v272_v52 = vld [vmem:[#allocation4 + $0x78] sm:$0xff]  ;;  %v269_v53 = vld [vmem:[#allocation4 + $0x60] sm:$0xff] }
  0x42   :  { %325 = vmatprep.subr.mxu0 %v310_v11  ;;  %396 = vmatprep.subr.mxu1 %v312_v12  ;;  %v271_v54 = vld [vmem:[#allocation4 + $0x70] sm:$0xff]  ;;  %v266_v55 = vld [vmem:[#allocation4 + $0x48] sm:$0xff]  ;;  %v268_v56 = vld [vmem:[#allocation4 + $0x58] sm:$0xff] }
  0x43   :  { %326 = vmatpush1.msra.mxu0 %v309_v13  ;;  %397 = vmatpush1.msra.mxu1 %v311_v14  ;;  %v265_v57 = vld [vmem:[#allocation4 + $0x40] sm:$0xff]  ;;  %v267_v58 = vld [vmem:[#allocation4 + $0x50] sm:$0xff]  ;;  %v262_v59 = vld [vmem:[#allocation4 + $0x28] sm:$0xff] }
  0x44   :  { %327 = vmatprep.subr.mxu0 %v306_v15  ;;  %398 = vmatprep.subr.mxu1 %v308_v16  ;;  %v264_v60 = vld [vmem:[#allocation4 + $0x38] sm:$0xff]  ;;  %v261_v61 = vld [vmem:[#allocation4 + $0x20] sm:$0xff]  ;;  %v263_v62 = vld [vmem:[#allocation4 + $0x30] sm:$0xff] }
  0x45   :  { %328 = vmatpush1.msra.mxu0 %v305_v17  ;;  %399 = vmatpush1.msra.mxu1 %v307_v18  ;;  %v258_v63 = vld [vmem:[#allocation4 + $0x8] sm:$0xff]  ;;  %v260_v1 = vld [vmem:[#allocation4 + $0x18] sm:$0xff]  ;;  %v257_v2 = vld [vmem:[#allocation4] sm:$0xff] }
  0x46   :  { %329 = vmatprep.subr.mxu0 %v302_v19  ;;  %400 = vmatprep.subr.mxu1 %v304_v20  ;;  %v259_v3 = vld [vmem:[#allocation4 + $0x10] sm:$0xff]  ;;  %v477_v4 = vld [vmem:[%s597_s0 + $0x8] sm:$0xff] }
  0x47   :  { %330 = vmatpush1.msra.mxu0 %v301_v21  ;;  %401 = vmatpush1.msra.mxu1 %v303_v22 }
  0x48   :  { %331 = vmatprep.subr.mxu0 %v298_v23  ;;  %402 = vmatprep.subr.mxu1 %v300_v24 }
  0x49   :  { %332 = vmatpush1.msra.mxu0 %v297_v25  ;;  %403 = vmatpush1.msra.mxu1 %v299_v26 }
  0x4a   :  { %333 = vmatprep.subr.mxu0 %v294_v27  ;;  %404 = vmatprep.subr.mxu1 %v296_v28 }
  0x4b   :  { %334 = vmatpush1.msra.mxu0 %v293_v29  ;;  %405 = vmatpush1.msra.mxu1 %v295_v30 }
  0x4c   :  { %335 = vmatprep.subr.mxu0 %v290_v31  ;;  %406 = vmatprep.subr.mxu1 %v292_v32 }
  0x4d   :  { %336 = vmatpush1.msra.mxu0 %v289_v33  ;;  %407 = vmatpush1.msra.mxu1 %v291_v34 }
  0x4e   :  { %337 = vmatprep.subr.mxu0 %v286_v35  ;;  %408 = vmatprep.subr.mxu1 %v288_v36 }
  0x4f   :  { %338 = vmatpush1.msra.mxu0 %v285_v37  ;;  %409 = vmatpush1.msra.mxu1 %v287_v38 }
  0x50   :  { %339 = vmatprep.subr.mxu0 %v282_v39  ;;  %410 = vmatprep.subr.mxu1 %v284_v40 }
  0x51   :  { %340 = vmatpush1.msra.mxu0 %v281_v41  ;;  %411 = vmatpush1.msra.mxu1 %v283_v42 }
  0x52   :  { %341 = vmatprep.subr.mxu0 %v278_v43  ;;  %412 = vmatprep.subr.mxu1 %v280_v44 }
  0x53   :  { %342 = vmatpush1.msra.mxu0 %v277_v45  ;;  %413 = vmatpush1.msra.mxu1 %v279_v46 }
  0x54   :  { %343 = vmatprep.subr.mxu0 %v274_v47  ;;  %414 = vmatprep.subr.mxu1 %v276_v48 }
  0x55   :  { %344 = vmatpush1.msra.mxu0 %v273_v49  ;;  %415 = vmatpush1.msra.mxu1 %v275_v50 }
  0x56   :  { %345 = vmatprep.subr.mxu0 %v270_v51  ;;  %416 = vmatprep.subr.mxu1 %v272_v52 }
  0x57   :  { %346 = vmatpush1.msra.mxu0 %v269_v53  ;;  %417 = vmatpush1.msra.mxu1 %v271_v54 }
  0x58   :  { %347 = vmatprep.subr.mxu0 %v266_v55  ;;  %418 = vmatprep.subr.mxu1 %v268_v56 }
  0x59   :  { %348 = vmatpush1.msra.mxu0 %v265_v57  ;;  %419 = vmatpush1.msra.mxu1 %v267_v58 }
  0x5a   :  { %349 = vmatprep.subr.mxu0 %v262_v59  ;;  %420 = vmatprep.subr.mxu1 %v264_v60 }
  0x5b   :  { %350 = vmatpush1.msra.mxu0 %v261_v61  ;;  %421 = vmatpush1.msra.mxu1 %v263_v62 }
  0x5c   :  { %351 = vmatprep.subr.mxu0 %v258_v63  ;;  %422 = vmatprep.subr.mxu1 %v260_v1 }
  0x5d   :  { %352 = vmatpush1.msra.mxu0 %v257_v2  ;;  %385 = vmatprep.mubr.f32.mxu0 %v531_v0 }
  0x5e   :  { %423 = vmatpush1.msra.mxu1 %v259_v3  ;;  %456 = vmatprep.mubr.f32.mxu1 %v531_v0 }
  0x5f   :  { %386 = vmatmul.mubr.f32.vlgmr.msra.gmra.mxu0 %v477_v4  ;;  %457 = vmatmul.mubr.f32.vlgmr.msra.gmra.mxu1 %v477_v4 }
  0xfd   :  { %v175_v5 = vpop.f32.mrf.mxu0  ;;  %v246_v6 = vpop.f32.mrf.mxu1 }
  0xfe   :  { %251 = vst [vmem:[%s600_s3] sm:$0xff] %v175_v5  ;;  %253 = vst [vmem:[%s600_s3 + $0x10] sm:$0xff] %v246_v6 }
  0xff   :  { %v177_v7 = vpop.f32.mrf.mxu0  ;;  %v248_v8 = vpop.f32.mrf.mxu1 }
 0x100   :  { %252 = vst [vmem:[%s600_s3 + $0x8] sm:$0xff] %v177_v7  ;;  %254 = vst [vmem:[%s600_s3 + $0x18] sm:$0xff] %v248_v8 }
 0x11f   :  { %v387_v0 = vpop.f32.mrf.mxu0  ;;  %v458_v9 = vpop.f32.mrf.mxu1 }
 0x120   :  { %463 = vst [vmem:[%s601_s4] sm:$0xff] %v387_v0  ;;  %465 = vst [vmem:[%s601_s4 + $0x10] sm:$0xff] %v458_v9 }
 0x121   :  { %v389_v10 = vpop.f32.mrf.mxu0  ;;  %v460_v11 = vpop.f32.mrf.mxu1 }
 0x122   :  { %464 = vst [vmem:[%s601_s4 + $0x8] sm:$0xff] %v389_v10  ;;  %466 = vst [vmem:[%s601_s4 + $0x18] sm:$0xff] %v460_v11 }
 0x123   :  { %475 = vsyncpa [#allocation3], 1 }
 0x124   :  { %476 = vsyncpa [#allocation5], 1 }

</bundles_post_ra>
